<compile_context>
chip_gen: v7x
topology: tpu7x:2x2x1
jax: 0.10.0
libtpu: 0.0.40
codegen_flags: <defaults>
</compile_context>

<pallas_src>
import functools

import jax
import jax.numpy as jnp
from jax.experimental import pallas as pl
from jax.experimental.pallas import tpu as pltpu


def _round_up(x, m):
    return (x + m - 1) // m * m


def _vmem_capacity_bytes():
    try:
        return int(pltpu.get_tpu_info().vmem_capacity_bytes)
    except Exception:
        return 64 * 1024 * 1024  # conservative fallback (v7x-sized TensorCore)


def _vmem_budgets():
    cap = _vmem_capacity_bytes()
    # per-block budget (double-buffered) and scoped-VMEM limit, scaled per chip:
    #   v5e/v6e (128 MiB): ~40 MiB blocks, ~80 MiB limit
    #   v7x     ( 64 MiB): ~20 MiB blocks, ~40 MiB limit
    block_budget = (cap * 5) // 16
    vmem_limit = min((cap * 5) // 8, 100 * 1024 * 1024)
    return block_budget, vmem_limit


# --------------------------------------------------------------------------
# compute_cache: cache = value @ W^T      (the module's self.W / compute_cache)
# --------------------------------------------------------------------------

def _cache_kernel(x_ref, wt_ref, o_ref):
    # x: (tn, Dv), wt: (Dv, Dq) -> o: (tn, Dq); standard MXU layout.
    o_ref[...] = jnp.dot(
        x_ref[...], wt_ref[...], preferred_element_type=jnp.float32
    ).astype(o_ref.dtype)


def compute_cache(value, W, *, row_block=512):
    """value: (B, L, Dv), W: (Dq, Dv) -> cache: (B, L, Dq)."""
    B, L, Dv = value.shape
    Dq = W.shape[0]
    N = B * L
    x = value.reshape(N, Dv)
    wt = jnp.transpose(W)  # (Dv, Dq): one-time wrapper-side transpose

    block_budget, vmem_limit = _vmem_budgets()
    itemsize = jnp.dtype(value.dtype).itemsize
    max_rows = max(8, block_budget // max(1, 2 * itemsize * (Dv + Dq)))
    row_block = min(row_block, max_rows)
    if N <= row_block:
        tn = N                                # block == full dim: always legal
    else:
        tn = max(8, (row_block // 8) * 8)     # sublane-aligned row block

    out_dtype = jnp.result_type(value.dtype, W.dtype)
    out = pl.pallas_call(
        _cache_kernel,
        out_shape=jax.ShapeDtypeStruct((N, Dq), out_dtype),
        grid_spec=pltpu.PrefetchScalarGridSpec(
            num_scalar_prefetch=0,
            grid=(pl.cdiv(N, tn),),
            in_specs=[
                pl.BlockSpec((tn, Dv), lambda i: (i, 0)),
                pl.BlockSpec((Dv, Dq), lambda i: (0, 0)),
            ],
            out_specs=pl.BlockSpec((tn, Dq), lambda i: (i, 0)),
        ),
        compiler_params=pltpu.CompilerParams(
            dimension_semantics=("parallel",),
            vmem_limit_bytes=vmem_limit),
    )(x, wt)
    return out.reshape(B, L, Dq)


# --------------------------------------------------------------------------
# fused attention + output projection kernel
# --------------------------------------------------------------------------

def _general_attention_kernel(*refs, has_mask):
    if has_mask:
        q_ref, cache_ref, value_ref, mask_ref, wt_ref, b_ref, out_ref = refs
    else:
        q_ref, cache_ref, value_ref, wt_ref, b_ref, out_ref = refs
        mask_ref = None

    q = q_ref[...].astype(jnp.float32)        # (bb, Dq)
    c = cache_ref[...].astype(jnp.float32)    # (bb, L, Dq)
    v = value_ref[...].astype(jnp.float32)    # (bb, L, Dv)

    # weight[b, l] = query[b] . cache[b, l]  (VPU multiply + lane reduce; no MXU)
    scores = jnp.sum(q[:, None, :] * c, axis=-1)          # (bb, L)

    if mask_ref is not None:
        scores = jnp.where(mask_ref[...] != 0, jnp.float32(-1e18), scores)

    # exact numerically-stable softmax over the key axis
    row_max = jnp.max(scores, axis=-1, keepdims=True)
    p = jnp.exp(scores - row_max)
    denom = jnp.sum(p, axis=-1, keepdims=True)
    attn = p / denom                                       # (bb, L)

    # context[b] = sum_l attn[b, l] * value[b, l]  (VPU multiply + sublane reduce)
    ctx = jnp.sum(attn[:, :, None] * v, axis=1)            # (bb, Dv)

    # output projection on the MXU: context @ W_out^T  (wt is pre-transposed)
    out = jnp.dot(ctx, wt_ref[...].astype(jnp.float32),
                  preferred_element_type=jnp.float32)      # (bb, Dq)
    out = out + b_ref[...].astype(jnp.float32)             # (1, Dq) broadcast
    out_ref[...] = out.astype(out_ref.dtype)


def _pick_batch_block(B, per_batch_bytes, budget_bytes):
    bb = max(1, int(budget_bytes // max(1, 2 * per_batch_bytes)))  # 2x: double buffer
    # keep >= 2 grid steps where possible so both v7x TensorCores get work
    if B > 8:
        bb = min(bb, _round_up(pl.cdiv(B, 2), 8))
    if bb >= B:
        return B                     # single block spanning the full batch dim
    return max(8, (bb // 8) * 8)     # sublane-aligned batch block


def _attention(query, cache, value, value_mask, W_out, b_out):
    """query: (B, Dq), cache: (B, L, Dq), value: (B, L, Dv) -> (B, Dq)."""
    B, Dq = query.shape
    Bv, L, Dv = value.shape
    assert cache.shape == (B, L, Dq), (
        f"cache shape {cache.shape} must be {(B, L, Dq)} (cache len must match "
        f"value len for the attention matmuls, as in the PyTorch module).")
    assert Bv == B
    has_mask = value_mask is not None

    block_budget, vmem_limit = _vmem_budgets()
    itemsize = max(jnp.dtype(cache.dtype).itemsize, jnp.dtype(value.dtype).itemsize)
    per_batch = itemsize * (L * (Dq + Dv) + 2 * Dq) + (L if has_mask else 0)
    bb = _pick_batch_block(B, per_batch, block_budget)

    wt_out = jnp.transpose(W_out)    # (Dv, Dq)
    b2 = b_out.reshape(1, Dq)

    args = [query, cache, value]
    in_specs = [
        pl.BlockSpec((bb, Dq), lambda i: (i, 0)),
        pl.BlockSpec((bb, L, Dq), lambda i: (i, 0, 0)),
        pl.BlockSpec((bb, L, Dv), lambda i: (i, 0, 0)),
    ]
    if has_mask:
        args.append(value_mask.astype(jnp.int8))      # int8 stream, only if given
        in_specs.append(pl.BlockSpec((bb, L), lambda i: (i, 0)))
    args += [wt_out, b2]
    in_specs += [
        pl.BlockSpec((Dv, Dq), lambda i: (0, 0)),
        pl.BlockSpec((1, Dq), lambda i: (0, 0)),
    ]

    kernel = functools.partial(_general_attention_kernel, has_mask=has_mask)
    out = pl.pallas_call(
        kernel,
        out_shape=jax.ShapeDtypeStruct((B, Dq), query.dtype),
        grid_spec=pltpu.PrefetchScalarGridSpec(
            num_scalar_prefetch=0,
            grid=(pl.cdiv(B, bb),),
            in_specs=in_specs,
            out_specs=pl.BlockSpec((bb, Dq), lambda i: (i, 0)),
        ),
        compiler_params=pltpu.CompilerParams(
            dimension_semantics=("parallel",),
            vmem_limit_bytes=vmem_limit),
    )(*args)
    return out


# --------------------------------------------------------------------------
# forward wrapper mirroring the PyTorch cache-selection branching
# --------------------------------------------------------------------------

def general_attention_forward(query, value, W, W_out, b_out,
                              enc_cache=None, emb_cache=None, hid_cache=None,
                              value_mask=None, inference=False):
    """query: (B, Dq), value: (B, L, Dv), value_mask: (B, L) bool or None."""
    if not inference:
        if enc_cache is not None:
            cache = enc_cache
        elif emb_cache is not None:
            cache = emb_cache
        else:
            cache = compute_cache(value[:, -1:, :], W)
        if hid_cache is not None:
            cache = jnp.concatenate((hid_cache, cache), axis=1)
    else:
        if enc_cache is not None:
            cache = enc_cache
        else:
            cache = compute_cache(value[:, -1:, :], W)
        if hid_cache is not None:
            cache = jnp.concatenate((hid_cache, cache), axis=1)
        if emb_cache is not None:
            cache = jnp.concatenate((emb_cache, cache), axis=1)

    attn_out = _attention(query, cache, value, value_mask, W_out, b_out)
    return attn_out, cache


# --------------------------------------------------------------------------
# demo / self-check
# --------------------------------------------------------------------------

if __name__ == "__main__":
    B, L, query_size, value_size = 2, 8, 32, 64

    key = jax.random.PRNGKey(0)
    kq, kv, kw, kwo, kb, km = jax.random.split(key, 6)
    query = jax.random.normal(kq, (B, query_size), jnp.float32)
    value = jax.random.normal(kv, (B, L, value_size), jnp.float32)
    # TODO(synk): my_init.default_init is an external initializer; scaled normal stands in here.
    W = jax.random.normal(kw, (query_size, value_size), jnp.float32) / value_size ** 0.5
    W_out = jax.random.normal(kwo, (query_size, value_size), jnp.float32) / value_size ** 0.5
    b_out = jax.random.normal(kb, (query_size,), jnp.float32) * 0.1
    value_mask = jax.random.bernoulli(km, p=0.25, shape=(B, L))

    # pure-JAX reference (high-precision matmuls so default-precision MXU
    # behaviour cannot skew the check)
    HI = jax.lax.Precision.HIGHEST
    ref_cache = jnp.einsum("blv,qv->blq", value, W, precision=HI)
    weight = jnp.einsum("bq,blq->bl", query, ref_cache, precision=HI)
    attn_m = jax.nn.softmax(jnp.where(value_mask, -1e18, weight), axis=-1)
    attn_nm = jax.nn.softmax(weight, axis=-1)

    def project(ctx):
        return jnp.dot(ctx, W_out.T, precision=HI) + b_out

    ref_out_m = project(jnp.einsum("bl,blv->bv", attn_m, value, precision=HI))
    ref_out_nm = project(jnp.einsum("bl,blv->bv", attn_nm, value, precision=HI))

    # 1) canonical encoder-attention path: precomputed enc_cache = W(value), with mask
    enc_cache = compute_cache(value, W)
    out, cache = general_attention_forward(
        query, value, W, W_out, b_out, enc_cache=enc_cache, value_mask=value_mask)
    out, cache = jax.block_until_ready((out, cache))
    assert out.shape == (B, query_size)
    assert cache.shape == (B, L, query_size)
    assert jnp.allclose(cache, ref_cache, atol=2e-3, rtol=2e-3)
    assert jnp.allclose(out, ref_out_m, atol=2e-3, rtol=2e-3)

    # 2) no-mask variant (mask stream dropped entirely)
    out_nm, _ = general_attention_forward(query, value, W, W_out, b_out,
                                          enc_cache=enc_cache)
    out_nm = jax.block_until_ready(out_nm)
    assert jnp.allclose(out_nm, ref_out_nm, atol=2e-3, rtol=2e-3)

    # 3) hid_cache path: cache = concat(hid_cache, W(value[:, -1:]))
    hid_cache = compute_cache(value[:, :-1, :], W)
    out_h, cache_h = general_attention_forward(
        query, value, W, W_out, b_out, hid_cache=hid_cache, value_mask=value_mask)
    out_h, cache_h = jax.block_until_ready((out_h, cache_h))
    assert cache_h.shape == (B, L, query_size)
    assert jnp.allclose(cache_h, ref_cache, atol=2e-3, rtol=2e-3)
    assert jnp.allclose(out_h, ref_out_m, atol=2e-3, rtol=2e-3)

    print("KERNEL_OK")
</pallas_src>

<mosaic_0001>
module attributes {stable_mosaic.version = 11 : i64} {
  func.func @_cache_kernel(%arg0: i32, %arg1: memref<16x64xf32, #tpu.memory_space<vmem>>, %arg2: memref<64x32xf32, #tpu.memory_space<vmem>>, %arg3: memref<16x32xf32, #tpu.memory_space<vmem>>) attributes {dimension_semantics = [#tpu.dimension_semantics<parallel>], iteration_bounds = array<i64: 1>, scalar_prefetch = 0 : i64, scratch_operands = 0 : i64, tpu.core_type = #tpu.core_type<tc>, window_params = [{transform_indices = @transform_0, window_bounds = array<i64: 16, 64>}, {pipeline_mode = #tpu.pipeline_mode<synchronous>, transform_indices = @transform_1, window_bounds = array<i64: 64, 32>}, {transform_indices = @transform_2, window_bounds = array<i64: 16, 32>}]} {
    %c0 = arith.constant 0 : index
    %c0_0 = arith.constant 0 : index
    %0 = vector.load %arg1[%c0, %c0_0] : memref<16x64xf32, #tpu.memory_space<vmem>>, vector<16x64xf32>
    %c0_1 = arith.constant 0 : index
    %c0_2 = arith.constant 0 : index
    %1 = vector.load %arg2[%c0_1, %c0_2] : memref<64x32xf32, #tpu.memory_space<vmem>>, vector<64x32xf32>
    %cst = arith.constant dense<0.000000e+00> : vector<16x32xf32>
    %2 = tpu.matmul %0, %1, %cst {dimension_numbers = #tpu.dot_dimension_numbers<[1], [0], [0], [1], [0, 0, 1, 1], [], []>} : vector<16x64xf32>, vector<64x32xf32>, vector<16x32xf32> -> vector<16x32xf32>
    %c0_3 = arith.constant 0 : index
    %c0_4 = arith.constant 0 : index
    %3 = vector.load %arg3[%c0_3, %c0_4] : memref<16x32xf32, #tpu.memory_space<vmem>>, vector<16x32xf32>
    tpu.vector_store %arg3[%c0_3, %c0_4], %2 {strides = array<i32>} : memref<16x32xf32, #tpu.memory_space<vmem>>, vector<16x32xf32>,
    return
  }
  func.func @transform_0(%arg0: i32) -> (i32, i32) {
    %c0_i32 = arith.constant 0 : i32
    %c0_i32_0 = arith.constant 0 : i32
    return %arg0, %c0_i32 : i32, i32
  }
  func.func @transform_1(%arg0: i32) -> (i32, i32) {
    %c0_i32 = arith.constant 0 : i32
    %c0_i32_0 = arith.constant 0 : i32
    %c0_i32_1 = arith.constant 0 : i32
    return %c0_i32, %c0_i32_0 : i32, i32
  }
  func.func @transform_2(%arg0: i32) -> (i32, i32) {
    %c0_i32 = arith.constant 0 : i32
    %c0_i32_0 = arith.constant 0 : i32
    return %arg0, %c0_i32 : i32, i32
  }
}

</mosaic_0001>

<bundles_post_ra>
// kernel: tpu_custom_call.1
= control target key start
LH: loop header
LB: loop body
LE: loop exit
PB: predicated region body
PF: predicated region fallthrough
CT: control target
= control target key end

     0   :  { %vm22_vm0 = vcmask 523264   ;;  %s259_s0 = inlined_call_operand.vmem [shape: f32[16,64], index: 0, kind: input, shape index: {}]   ;;  %s260_s1 = inlined_call_operand.vmem [shape: f32[64,32], index: 1, kind: input, shape index: {}]   ;;  %s261_s2 = inlined_call_operand.hbm [shape: f32[16,32], index: 2, kind: output, shape index: {}]  }
   0x1   :  { %v14_v0 = vld [vmem:[%s260_s1] sm:$0xff]  ;;  %v15_v1 = vld [vmem:[%s260_s1 + $0x8] sm:$0xff]  ;;  %v16_v2 = vld [vmem:[%s260_s1 + $0x10] sm:$0xff] }
   0x2   :  { %v154_v3 = vpack.c.bf16 %v15_v1, %v14_v0  ;;  %v17_v4 = vld [vmem:[%s260_s1 + $0x18] sm:$0xff]  ;;  %v18_v6 = vld [vmem:[%s260_s1 + $0x20] sm:$0xff]  ;;  %v19_v7 = vld [vmem:[%s260_s1 + $0x28] sm:$0xff] }
   0x3   :  { %v158_v5 = vpack.c.bf16 %v17_v4, %v16_v2  ;;  %v12_v8 = vld [vmem:[%s259_s0] sm:$0xff] }
   0x4   :  { %155 = vmatprep.subr.bf16.mxu0 %v154_v3  ;;  %151 = vmatprep.mubr.msk.f32.mxu0 %vm22_vm0, %v12_v8 }
   0x5   :  { %7 = vsyncpa [#allocation3], 0  ;;  %157 = vmatpush3.bf16.msra.mxu0 %v154_v3  ;;  %v162_v9 = vpack.c.bf16 %v19_v7, %v18_v6  ;;  %v20_v10 = vld [vmem:[%s260_s1 + $0x30] sm:$0xff]  ;;  %v21_v11 = vld [vmem:[%s260_s1 + $0x38] sm:$0xff]  ;;  %s197_s29 = smov [#allocation2]   ;;  %vm104_vm1 = vcmask 261120  }
   0x6   :  { %159 = vmatprep.subr.bf16.mxu0 %v158_v5  ;;  %v166_v12 = vpack.c.bf16 %v21_v11, %v20_v10  ;;  %v13_v13 = vld [vmem:[%s259_s0 + $0x8] sm:$0xff]  ;;  %s112_s30 = sshll.u32 %s197_s29, 4  ;;  %s113_s30 = int_to_ptr.vmem [resolvable:$true] %s112_s30 }
   0x7   :  { %s173_s1 = scalar_lea.vmem %s113_s30, 256  ;;  %p178_p1 = scmp.lt.s32.totalorder %s113_s30, %s113_s30 }
   0x8   :  { %p174_p0 = scmp.ne.s32.totalorder %s113_s30, %s173_s1  ;;  %p179_p2 = scmp.lt.s32.totalorder %s173_s1, %s173_s1 }
   0x9   :  { %161 = vmatpush3.bf16.msra.mxu0 %v158_v5 }
   0xa   :  { %163 = vmatprep.subr.bf16.mxu0 %v162_v9  ;;  %p180_p3 = por %p179_p2, %p178_p1 }
   0xc   :  { %p181_p4 = pnand %p180_p3, %p174_p0 }
   0xd   :  { %165 = vmatpush3.bf16.msra.mxu0 %v162_v9 }
   0xe   :  { %167 = vmatprep.subr.bf16.mxu0 %v166_v12 }
  0x11   :  { %169 = vmatpush3.bf16.msra.mxu0 %v166_v12 }
  0x14   :  { %152 = vmatmul.mubr.msk.f32.vlgmr.msra.gmra.mrb[0].mxu0 %vm22_vm0, %v13_v13 }
  0xe7   :  { %v153_v14 = vpop.f32.mrb[0].mxu0 }
  0xe8   :  { %106 = vst.msk [vmem:[#allocation2 + $0x8] sm:$0xff] %vm104_vm1, %v153_v14  ;;  %v95_v15 = vpop.f32.mrb[1].mxu0 }
  0xe9   :  { %105 = vst.msk [vmem:[#allocation2] sm:$0xff] %vm104_vm1, %v95_v15 }
  0xea   :  { %184 = shalt.err (!%p181_p4)
}
  0xeb   :  { %s185_s0 = scalar_lea.hbm %s261_s2, 256 }
  0xec   :  { %p186_p5 = scmp.ne.s32.totalorder %s261_s2, %s185_s0  ;;  %p189_p6 = scmp.lt.u32.totalorder %s185_s0, %s261_s2 }
  0xee   :  { %p191_p7 = pnand %p189_p6, %p186_p5 }
  0xf0   :  { %194 = shalt.err (!%p191_p7)
}
  0xf1   :  { %s198_s9 = smov 128   ;;  %s199_s10 = smov 8  }
  0xf2   :  { %118 = dma.vmem_to_hbm [thread:$0]  %s113_s30, 256, %s261_s2, [#allocation3], %s198_s9, %s198_s9, %s199_s10  }
  0xf3   :  { %195 = dma.done.wait [#allocation3], 256  }
  0xf4   :  { %196 = vsyncadd [#allocation3], 4294967040 }
  0xf5   :  { %122 = vsyncpa [#allocation3], 1 }

</bundles_post_ra>
